<compile_context>
chip_gen: v7x
topology: tpu7x:2x2x1
jax: 0.10.0
libtpu: 0.0.40
codegen_flags: <defaults>
</compile_context>

<pallas_src>
import functools

import jax
import jax.numpy as jnp
from jax import lax
from jax.experimental import pallas as pl
from jax.experimental.pallas import tpu as pltpu

MARGIN = 1.0
POS_MARGIN = 0.7
IGNORE_INDEX = -1

_SUBLANES = 8
_LANES = 128
_SUB_ROWS = 512                 # compute sub-chunk rows (bounds live VMEM temporaries)
_DEFAULT_BLOCK_ROWS = 8192      # 8192*128*4B = 4 MiB per f32 input per buffer


def _chunk_partials(d, lab, row0, *, margin, pos_margin, masked, total_rows):
    """(rows,128) chunk -> four (1,128) sublane-reduced partials.

    Returns (count_neg_hard, count_pos_hard, sum_neg_sq, sum_pos_sq).
    """
    neg_lab = lab == 0
    pos_lab = lab == 1
    if masked:
        row = lax.broadcasted_iota(jnp.int32, d.shape, 0) + row0
        in_range = row < total_rows
        neg_lab = jnp.logical_and(neg_lab, in_range)
        pos_lab = jnp.logical_and(pos_lab, in_range)
    neg_hard = jnp.logical_and(neg_lab, d < margin)
    pos_hard = jnp.logical_and(pos_lab, d > pos_margin)
    # Keep select (vsel) semantics so garbage/NaN read in ragged OOB rows
    # cannot poison the sums (0 * NaN would).
    t_neg = jnp.where(neg_hard, margin - d, 0.0)
    t_pos = jnp.where(pos_hard, d - pos_margin, 0.0)
    cn = jnp.sum(neg_hard.astype(jnp.float32), axis=0, keepdims=True)
    cp = jnp.sum(pos_hard.astype(jnp.float32), axis=0, keepdims=True)
    sn = jnp.sum(t_neg * t_neg, axis=0, keepdims=True)
    sp = jnp.sum(t_pos * t_pos, axis=0, keepdims=True)
    return cn, cp, sn, sp


def _partials_kernel(data_ref, labels_ref, out_ref, *, margin, pos_margin,
                     block_rows, sub_rows, n_sub, total_rows, mask_last):
    """One (block_rows,128) block -> one (1,4,128) block of lane partials."""
    lanes = out_ref.shape[-1]
    block_row0 = pl.program_id(0) * block_rows

    def compute(masked):
        if n_sub == 1:
            return _chunk_partials(
                data_ref[...].astype(jnp.float32), labels_ref[...], block_row0,
                margin=margin, pos_margin=pos_margin, masked=masked,
                total_rows=total_rows)

        def body(c, acc):
            start = pl.multiple_of(c * sub_rows, sub_rows)
            d = data_ref[pl.ds(start, sub_rows), :].astype(jnp.float32)
            lab = labels_ref[pl.ds(start, sub_rows), :]
            part = _chunk_partials(
                d, lab, block_row0 + start,
                margin=margin, pos_margin=pos_margin, masked=masked,
                total_rows=total_rows)
            return tuple(a + p for a, p in zip(acc, part))

        init = tuple(jnp.zeros((1, lanes), jnp.float32) for _ in range(4))
        return lax.fori_loop(0, n_sub, body, init, unroll=min(4, n_sub))

    def store(masked):
        cn, cp, sn, sp = compute(masked)
        out_ref[...] = jnp.concatenate([cn, cp, sn, sp],
                                       axis=0).reshape(1, 4, lanes)

    if mask_last:
        last = pl.num_programs(0) - 1

        @pl.when(pl.program_id(0) != last)
        def _():
            store(False)

        @pl.when(pl.program_id(0) == last)
        def _():
            store(True)
    else:
        store(False)


def _tail_partials(d, lab, margin, pos_margin):
    """Plain-JAX partials for the <=127-element unaligned tail."""
    d = d.astype(jnp.float32)
    neg_hard = (lab == 0) & (d < margin)
    pos_hard = (lab == 1) & (d > pos_margin)
    t_neg = jnp.where(neg_hard, margin - d, 0.0)
    t_pos = jnp.where(pos_hard, d - pos_margin, 0.0)
    return (jnp.sum(neg_hard.astype(jnp.float32)),
            jnp.sum(pos_hard.astype(jnp.float32)),
            jnp.sum(t_neg * t_neg),
            jnp.sum(t_pos * t_pos))


def contrastive_loss_double_margin(data, labels, *, margin=MARGIN,
                                   pos_margin=POS_MARGIN,
                                   ignore_index=IGNORE_INDEX,
                                   block_rows=_DEFAULT_BLOCK_ROWS,
                                   sub_rows=_SUB_ROWS):
    # `ignore_index` is honored via the precondition labels ∈ {ignore, 0, 1}:
    # any value other than 0/1 is ignored (exactly the module's behavior for
    # such label sets).
    del ignore_index

    data_flat = data.reshape(-1)          # keep dtype; cast to f32 in-kernel
    labels_flat = labels.reshape(-1)      # keep native integer dtype
    n = data_flat.shape[0]
    if labels_flat.shape[0] != n:
        raise ValueError("data/labels element counts must match (expects C == 1)")

    sub_rows = max(_SUBLANES, (int(sub_rows) // _SUBLANES) * _SUBLANES)
    rows = n // _LANES
    n_main = rows * _LANES

    if rows > 0:
        # 128-aligned prefix only; no pad copy of the full arrays.
        data_2d = data_flat[:n_main].reshape(rows, _LANES)
        labels_2d = labels_flat[:n_main].reshape(rows, _LANES)

        blk = min(block_rows, rows)
        # Keep >= 2 grid steps whenever there is enough work so the "parallel"
        # grid axis can shard across both TensorCores on v7x (no-op v5e/v6e).
        if rows >= 2 * _SUBLANES:
            half = -(-rows // 2)
            half = -(-half // _SUBLANES) * _SUBLANES
            blk = min(blk, half)
        if blk < rows:
            if blk >= sub_rows:
                blk = (blk // sub_rows) * sub_rows        # whole sub-chunks
            else:
                blk = max(_SUBLANES, (blk // _SUBLANES) * _SUBLANES)
        num_blocks = -(-rows // blk)
        mask_last = (num_blocks * blk) != rows            # ragged last block
        n_sub = blk // sub_rows if (blk > sub_rows and blk % sub_rows == 0) else 1

        kernel = functools.partial(
            _partials_kernel, margin=float(margin), pos_margin=float(pos_margin),
            block_rows=blk, sub_rows=min(sub_rows, blk), n_sub=n_sub,
            total_rows=rows, mask_last=mask_last)

        in_spec = pl.BlockSpec((blk, _LANES), lambda i: (i, 0))
        out_spec = pl.BlockSpec((1, 4, _LANES), lambda i: (i, 0, 0))

        d_bytes = data_2d.dtype.itemsize
        l_bytes = labels_2d.dtype.itemsize
        # Double-buffered inputs + sub-chunk temporaries, with headroom; keeps
        # v5e happy past its 16 MiB scoped default, stays < 64 MiB v7x VMEM.
        vmem_need = 2 * blk * _LANES * (d_bytes + l_bytes)
        vmem_need += 8 * min(sub_rows, blk) * _LANES * 4
        vmem_limit = int(min(max(vmem_need + (8 << 20), 24 << 20), 56 << 20))

        cost = pl.CostEstimate(
            flops=20 * n_main,
            transcendentals=0,
            bytes_accessed=n_main * (d_bytes + l_bytes)
            + num_blocks * 4 * _LANES * 4)

        parts = pl.pallas_call(
            kernel,
            out_shape=jax.ShapeDtypeStruct((num_blocks, 4, _LANES), jnp.float32),
            grid=(num_blocks,),
            in_specs=[in_spec, in_spec],
            out_specs=out_spec,
            compiler_params=pltpu.CompilerParams(
                dimension_semantics=("parallel",),
                vmem_limit_bytes=vmem_limit),
            cost_estimate=cost,
        )(data_2d, labels_2d)

        # Tiny epilogue: cross-lane / cross-block combine.
        sums = jnp.sum(parts, axis=(0, 2))            # (4,)
        n_neg, n_pos, s_neg, s_pos = sums[0], sums[1], sums[2], sums[3]
    else:
        zero = jnp.float32(0.0)
        n_neg = n_pos = s_neg = s_pos = zero

    if n_main < n:
        # <=127-element lane tail folded in with plain JAX (avoids jnp.pad copy).
        tn, tp, tsn, tsp = _tail_partials(
            data_flat[n_main:], labels_flat[n_main:],
            float(margin), float(pos_margin))
        n_neg = n_neg + tn
        n_pos = n_pos + tp
        s_neg = s_neg + tsn
        s_pos = s_pos + tsp

    total = n_neg + n_pos
    # NOTE: total == 0 (nothing mined) -> NaN, same as the PyTorch module.
    w0 = 1.0 + n_pos / total   # weights[0] -> negative term
    w1 = 1.0 + n_neg / total   # weights[1] -> positive term
    return (w0 * s_neg + w1 * s_pos) / total


def _reference(data, labels, *, margin=MARGIN, pos_margin=POS_MARGIN,
               ignore_index=IGNORE_INDEX):
    """Faithful plain-JAX translation of the PyTorch forward (miner path)."""
    d = data.reshape(-1).astype(jnp.float32)
    lab = labels.reshape(-1)
    valid = lab != ignore_index
    neg_hard = valid & (lab != 1) & (d < margin)
    pos_hard = valid & (lab != 0) & (d > pos_margin)
    n_neg = jnp.sum(neg_hard.astype(jnp.float32))
    n_pos = jnp.sum(pos_hard.astype(jnp.float32))
    total = n_neg + n_pos
    w0 = 1.0 + n_pos / total
    w1 = 1.0 + n_neg / total
    s_neg = jnp.sum(jnp.where(neg_hard, jnp.maximum(margin - d, 0.0), 0.0) ** 2)
    s_pos = jnp.sum(jnp.where(pos_hard, jnp.maximum(d - pos_margin, 0.0), 0.0) ** 2)
    return (w0 * s_neg + w1 * s_pos) / total


if __name__ == "__main__":
    key = jax.random.PRNGKey(0)

    def make_case(k, shape_bchw):
        k_d, k_l = jax.random.split(k)
        B, C, H, W = shape_bchw
        data = jax.random.uniform(k_d, (B, C, H, W), jnp.float32,
                                  minval=0.0, maxval=1.5)
        labels = jax.random.randint(k_l, (B, H, W), -1, 2).astype(jnp.int32)
        return data, labels

    cases = [
        ((1, 1, 5, 7), {}),                      # < 128 elems: pure JAX tail path
        ((2, 1, 16, 16), {}),                    # single full-dim block
        ((1, 1, 33, 37), {}),                    # lane tail + small block
        ((1, 1, 100, 128), {}),                  # 2 blocks, ragged last (pl.when mask)
        ((2, 1, 512, 512), {}),                  # multi-block + in-kernel sub-chunk loop
        ((1, 1, 96, 128), dict(block_rows=16)),  # forced small blocks, many grid steps
    ]
    keys = jax.random.split(key, len(cases))
    for k, (shape, kwargs) in zip(keys, cases):
        data, labels = make_case(k, shape)
        out = jax.block_until_ready(
            contrastive_loss_double_margin(data, labels, **kwargs))
        ref = jax.block_until_ready(_reference(data, labels))
        assert jnp.allclose(out, ref, rtol=1e-4, atol=1e-6), (shape, out, ref)

    print("KERNEL_OK")
</pallas_src>

<mosaic_0001>
module attributes {stable_mosaic.version = 11 : i64} {
  func.func @_partials_kernel(%arg0: i32, %arg1: memref<4x128xf32, #tpu.memory_space<vmem>>, %arg2: memref<4x128xi32, #tpu.memory_space<vmem>>, %arg3: memref<1x4x128xf32, #tpu.memory_space<vmem>>) attributes {dimension_semantics = [#tpu.dimension_semantics<parallel>], iteration_bounds = array<i64: 1>, scalar_prefetch = 0 : i64, scratch_operands = 0 : i64, tpu.core_type = #tpu.core_type<tc>, window_params = [{transform_indices = @transform_0, window_bounds = array<i64: 4, 128>}, {transform_indices = @transform_1, window_bounds = array<i64: 4, 128>}, {transform_indices = @transform_2, window_bounds = array<i64: 1, 4, 128>}]} {
    %c0 = arith.constant 0 : index
    %c0_0 = arith.constant 0 : index
    %0 = vector.load %arg1[%c0, %c0_0] : memref<4x128xf32, #tpu.memory_space<vmem>>, vector<4x128xf32>
    %c0_1 = arith.constant 0 : index
    %c0_2 = arith.constant 0 : index
    %1 = vector.load %arg2[%c0_1, %c0_2] : memref<4x128xi32, #tpu.memory_space<vmem>>, vector<4x128xi32>
    %c0_i32 = arith.constant 0 : i32
    %2 = vector.broadcast %c0_i32 : i32 to vector<4x128xi32>
    %3 = arith.cmpi eq, %1, %2 : vector<4x128xi32>
    %c1_i32 = arith.constant 1 : i32
    %4 = vector.broadcast %c1_i32 : i32 to vector<4x128xi32>
    %5 = arith.cmpi eq, %1, %4 : vector<4x128xi32>
    %cst = arith.constant 1.000000e+00 : f32
    %6 = vector.broadcast %cst : f32 to vector<4x128xf32>
    %7 = arith.cmpf olt, %0, %6 : vector<4x128xf32>
    %8 = arith.andi %3, %7 : vector<4x128xi1>
    %cst_3 = arith.constant 0.699999988 : f32
    %9 = vector.broadcast %cst_3 : f32 to vector<4x128xf32>
    %10 = arith.cmpf ogt, %0, %9 : vector<4x128xf32>
    %11 = arith.andi %5, %10 : vector<4x128xi1>
    %cst_4 = arith.constant 1.000000e+00 : f32
    %12 = vector.broadcast %cst_4 : f32 to vector<4x128xf32>
    %13 = arith.subf %12, %0 : vector<4x128xf32>
    %cst_5 = arith.constant 0.000000e+00 : f32
    %14 = vector.broadcast %cst_5 : f32 to vector<4x128xf32>
    %15 = arith.select %8, %13, %14 : vector<4x128xi1>, vector<4x128xf32>
    %cst_6 = arith.constant 0.699999988 : f32
    %16 = vector.broadcast %cst_6 : f32 to vector<4x128xf32>
    %17 = arith.subf %0, %16 : vector<4x128xf32>
    %cst_7 = arith.constant 0.000000e+00 : f32
    %18 = vector.broadcast %cst_7 : f32 to vector<4x128xf32>
    %19 = arith.select %11, %17, %18 : vector<4x128xi1>, vector<4x128xf32>
    %20 = arith.extui %8 : vector<4x128xi1> to vector<4x128xi32>
    %21 = arith.sitofp %20 : vector<4x128xi32> to vector<4x128xf32>
    %cst_8 = arith.constant dense<0.000000e+00> : vector<128xf32>
    %22 = vector.multi_reduction <add>, %21, %cst_8 [0] : vector<4x128xf32> to vector<128xf32>
    %23 = vector.shape_cast %22 : vector<128xf32> to vector<1x128xf32>
    %24 = arith.extui %11 : vector<4x128xi1> to vector<4x128xi32>
    %25 = arith.sitofp %24 : vector<4x128xi32> to vector<4x128xf32>
    %cst_9 = arith.constant dense<0.000000e+00> : vector<128xf32>
    %26 = vector.multi_reduction <add>, %25, %cst_9 [0] : vector<4x128xf32> to vector<128xf32>
    %27 = vector.shape_cast %26 : vector<128xf32> to vector<1x128xf32>
    %28 = arith.mulf %15, %15 : vector<4x128xf32>
    %cst_10 = arith.constant dense<0.000000e+00> : vector<128xf32>
    %29 = vector.multi_reduction <add>, %28, %cst_10 [0] : vector<4x128xf32> to vector<128xf32>
    %30 = vector.shape_cast %29 : vector<128xf32> to vector<1x128xf32>
    %31 = arith.mulf %19, %19 : vector<4x128xf32>
    %cst_11 = arith.constant dense<0.000000e+00> : vector<128xf32>
    %32 = vector.multi_reduction <add>, %31, %cst_11 [0] : vector<4x128xf32> to vector<128xf32>
    %33 = vector.shape_cast %32 : vector<128xf32> to vector<1x128xf32>
    %34 = tpu.concatenate %23, %27, %30, %33 in 0 : vector<1x128xf32>, vector<1x128xf32>, vector<1x128xf32>, vector<1x128xf32> -> vector<4x128xf32>
    %35 = vector.shape_cast %34 : vector<4x128xf32> to vector<1x4x128xf32>
    %c0_12 = arith.constant 0 : index
    %c0_13 = arith.constant 0 : index
    %c0_14 = arith.constant 0 : index
    %36 = vector.load %arg3[%c0_12, %c0_13, %c0_14] : memref<1x4x128xf32, #tpu.memory_space<vmem>>, vector<1x4x128xf32>
    tpu.vector_store %arg3[%c0_12, %c0_13, %c0_14], %35 {strides = array<i32>} : memref<1x4x128xf32, #tpu.memory_space<vmem>>, vector<1x4x128xf32>,
    return
  }
  func.func @transform_0(%arg0: i32) -> (i32, i32) {
    %c0_i32 = arith.constant 0 : i32
    %c0_i32_0 = arith.constant 0 : i32
    return %arg0, %c0_i32 : i32, i32
  }
  func.func @transform_1(%arg0: i32) -> (i32, i32) {
    %c0_i32 = arith.constant 0 : i32
    %c0_i32_0 = arith.constant 0 : i32
    return %arg0, %c0_i32 : i32, i32
  }
  func.func @transform_2(%arg0: i32) -> (i32, i32, i32) {
    %c0_i32 = arith.constant 0 : i32
    %c0_i32_0 = arith.constant 0 : i32
    %c0_i32_1 = arith.constant 0 : i32
    return %arg0, %c0_i32, %c0_i32_0 : i32, i32, i32
  }
}

</mosaic_0001>

<bundles_post_ra>
// kernel: tpu_custom_call.1
= control target key start
LH: loop header
LB: loop body
LE: loop exit
PB: predicated region body
PF: predicated region fallthrough
CT: control target
= control target key end

     0   :  { %7 = vsyncpa [#allocation3], 0  ;;  %s244_s0 = inlined_call_operand.hbm [shape: f32[4,128], index: 0, kind: input, shape index: {}]   ;;  %s245_s1 = inlined_call_operand.hbm [shape: s32[4,128], index: 1, kind: input, shape index: {}]   ;;  %s246_s2 = inlined_call_operand.hbm [shape: f32[1,4,128], index: 2, kind: output, shape index: {}]  }
   0x1   :  { %8 = vsyncpa [#allocation6], 0 }
   0x2   :  { %9 = vsyncpa [#allocation4], 0  ;;  %s185_s9 = smov [#allocation2]   ;;  %s186_s11 = smov [#allocation5]  }
   0x3   :  { %s16_s10 = sshll.u32 %s185_s9, 4  ;;  %s26_s12 = sshll.u32 %s186_s11, 4  ;;  %s17_s10 = int_to_ptr.vmem [resolvable:$true] %s16_s10  ;;  %s27_s12 = int_to_ptr.vmem [resolvable:$true] %s26_s12 }
   0x4   :  { %s113_s15 = scalar_lea.hbm %s244_s0, 64 }
   0x5   :  { %p114_p0 = scmp.ne.s32.totalorder %s244_s0, %s113_s15  ;;  %p117_p1 = scmp.lt.u32.totalorder %s113_s15, %s244_s0 }
   0x7   :  { %p119_p2 = pnand %p117_p1, %p114_p0 }
   0x9   :  { %122 = shalt.err (!%p119_p2)
}
   0xa   :  { %s123_s20 = scalar_lea.vmem %s17_s10, 64  ;;  %p128_p4 = scmp.lt.s32.totalorder %s17_s10, %s17_s10 }
   0xb   :  { %p124_p3 = scmp.ne.s32.totalorder %s17_s10, %s123_s20  ;;  %p129_p5 = scmp.lt.s32.totalorder %s123_s20, %s123_s20 }
   0xd   :  { %p130_p6 = por %p129_p5, %p128_p4 }
   0xf   :  { %p131_p7 = pnand %p130_p6, %p124_p3 }
  0x11   :  { %134 = shalt.err (!%p131_p7)
}
  0x12   :  { %19 = dma.hbm_to_vmem [thread:$0]  %s244_s0, 64, %s17_s10, [#allocation3]  }
  0x13   :  { %s135_s25 = scalar_lea.hbm %s245_s1, 64 }
  0x14   :  { %p136_p8 = scmp.ne.s32.totalorder %s245_s1, %s135_s25  ;;  %p139_p9 = scmp.lt.u32.totalorder %s135_s25, %s245_s1 }
  0x16   :  { %p141_p10 = pnand %p139_p9, %p136_p8 }
  0x18   :  { %144 = shalt.err (!%p141_p10)
}
  0x19   :  { %s145_s30 = scalar_lea.vmem %s27_s12, 64  ;;  %p150_p12 = scmp.lt.s32.totalorder %s27_s12, %s27_s12 }
  0x1a   :  { %p146_p11 = scmp.ne.s32.totalorder %s27_s12, %s145_s30  ;;  %p151_p13 = scmp.lt.s32.totalorder %s145_s30, %s145_s30 }
  0x1c   :  { %p152_p0 = por %p151_p13, %p150_p12 }
  0x1e   :  { %p153_p1 = pnand %p152_p0, %p146_p11 }
  0x20   :  { %156 = shalt.err (!%p153_p1)
}
  0x21   :  { %29 = dma.hbm_to_vmem [thread:$0]  %s245_s1, 64, %s27_s12, [#allocation6]  }
  0x22   :  { %179 = dma.done.wait [#allocation3], 64  }
  0x23   :  { %180 = vsyncadd [#allocation3], 4294967232 }
  0x24   :  { %181 = dma.done.wait [#allocation6], 64  }
  0x25   :  { %182 = vsyncadd [#allocation6], 4294967232  ;;  %v36_v0 = vld [vmem:[#allocation2] sm:$0xf]  ;;  %v37_v1 = vld [vmem:[#allocation5] sm:$0xf] }
  0x26   :  { %vm50_vm0 = vcmask 1043456   ;;  %vm38_vm1 = vcmp.eq.s32.totalorder %v37_v1, 0  ;;  %vm39_vm2 = vcmp.eq.s32.totalorder %v37_v1, 1  ;;  %vm40_vm3 = vcmp.lt.f32.partialorder %v36_v0, 1.0  ;;  %s188_s1 = smov [#allocation7]  }
  0x27   :  { %vm42_vm4 = vcmp.gt.f32.partialorder %v36_v0, 0.7  ;;  %vm41_vm5 = vmand %vm38_vm1, %vm40_vm3  ;;  %v44_v2 = vsub.f32 1.0, %v36_v0  ;;  %v106_v3 = vadd.f32 -0.7, %v36_v0  ;;  %v187_v4 = vmov 0.0  }
  0x28   :  { %vm43_vm6 = vmand %vm39_vm2, %vm42_vm4  ;;  %v107_v5 = vsel %vm41_vm5, 1.0, %v187_v4  ;;  %vm83_vm7 = vcmask 1040384   ;;  %vm85_vm8 = vcmask 1041408   ;;  %s96_s4 = sshll.u32 %s188_s1, 4  ;;  %vm87_vm9 = vcmask 1042432   ;;  %s97_s4 = int_to_ptr.vmem [resolvable:$true] %s96_s4 }
  0x29   :  { %v45_v6 = vsel %vm41_vm5, %v44_v2, 0.0  ;;  %v47_v7 = vsel %vm43_vm6, %v106_v3, 0.0  ;;  %v51_v8 = vsel %vm50_vm0, %v107_v5, 0.0  ;;  %v108_v9 = vsel %vm43_vm6, 1.0, %v187_v4  ;;  %s157_s5 = scalar_lea.vmem %s97_s4, 64  ;;  %p162_p3 = scmp.lt.s32.totalorder %s97_s4, %s97_s4 }
  0x2a   :  { %v52_v10 = vrot.slane %v51_v8, 4  ;;  %v60_v11 = vsel %vm50_vm0, %v108_v9, 0.0  ;;  %v67_v12 = vmul.f32 %v45_v6, %v45_v6  ;;  %v75_v13 = vmul.f32 %v47_v7, %v47_v7  ;;  %p158_p2 = scmp.ne.s32.totalorder %s97_s4, %s157_s5  ;;  %p163_p4 = scmp.lt.s32.totalorder %s157_s5, %s157_s5 }
  0x2b   :  { %v61_v14 = vrot.slane %v60_v11, 4 }
  0x2c   :  { %v53_v15 = vadd.f32 %v52_v10, %v51_v8  ;;  %v68_v16 = vsel %vm50_vm0, %v67_v12, 0.0  ;;  %v76_v17 = vsel %vm50_vm0, %v75_v13, 0.0  ;;  %p164_p5 = por %p163_p4, %p162_p3 }
  0x2d   :  { %v62_v18 = vadd.f32 %v61_v14, %v60_v11  ;;  %v69_v19 = vrot.slane %v68_v16, 4  ;;  %v77_v20 = vrot.slane %v76_v17, 4 }
  0x2e   :  { %v54_v21 = vrot.slane %v53_v15, 2  ;;  %p165_p6 = pnand %p164_p5, %p158_p2 }
  0x2f   :  { %v63_v22 = vrot.slane %v62_v18, 2  ;;  %v70_v23 = vadd.f32 %v69_v19, %v68_v16  ;;  %v78_v24 = vadd.f32 %v77_v20, %v76_v17 }
  0x30   :  { %v55_v25 = vadd.f32 %v54_v21, %v53_v15 }
  0x31   :  { %v64_v26 = vadd.f32 %v63_v22, %v62_v18  ;;  %v71_v27 = vrot.slane %v70_v23, 2  ;;  %v79_v28 = vrot.slane %v78_v24, 2 }
  0x32   :  { %v56_v29 = vrot.slane %v55_v25, 1 }
  0x33   :  { %v65_v30 = vrot.slane %v64_v26, 1  ;;  %v72_v31 = vadd.f32 %v71_v27, %v70_v23  ;;  %v80_v32 = vadd.f32 %v79_v28, %v78_v24 }
  0x34   :  { %v57_v33 = vadd.f32 %v56_v29, %v55_v25 }
  0x35   :  { %v66_v34 = vadd.f32 %v65_v30, %v64_v26  ;;  %v73_v35 = vrot.slane %v72_v31, 1  ;;  %v81_v36 = vrot.slane %v80_v32, 1 }
  0x37   :  { %v74_v37 = vadd.f32 %v73_v35, %v72_v31  ;;  %v82_v38 = vadd.f32 %v81_v36, %v80_v32  ;;  %v84_v39 = vsel %vm83_vm7, %v57_v33, %v66_v34 }
  0x39   :  { %v86_v40 = vsel %vm85_vm8, %v84_v39, %v74_v37 }
  0x3a   :  { %v88_v41 = vsel %vm87_vm9, %v86_v40, %v82_v38 }
  0x3b   :  { %89 = vst [vmem:[#allocation7] sm:$0xf] %v88_v41 }
  0x3c   :  { %168 = shalt.err (!%p165_p6)
}
  0x3d   :  { %s169_s8 = scalar_lea.hbm %s246_s2, 64 }
  0x3e   :  { %p170_p7 = scmp.ne.s32.totalorder %s246_s2, %s169_s8  ;;  %p173_p8 = scmp.lt.u32.totalorder %s169_s8, %s246_s2 }
  0x40   :  { %p175_p9 = pnand %p173_p8, %p170_p7 }
  0x42   :  { %178 = shalt.err (!%p175_p9)
}
  0x43   :  { %99 = dma.vmem_to_hbm [thread:$0]  %s97_s4, 64, %s246_s2, [#allocation4]  }
  0x44   :  { %183 = dma.done.wait [#allocation4], 64  }
  0x45   :  { %184 = vsyncadd [#allocation4], 4294967232 }
  0x46   :  { %103 = vsyncpa [#allocation3], 1 }
  0x47   :  { %104 = vsyncpa [#allocation6], 1 }
  0x48   :  { %105 = vsyncpa [#allocation4], 1 }

</bundles_post_ra>
